<compile_context>
chip_gen: v7x
topology: tpu7x:2x2x1
jax: 0.10.0
libtpu: 0.0.40
codegen_flags: <defaults>
</compile_context>

<pallas_src>
import functools

import jax
import jax.numpy as jnp
from jax.experimental import pallas as pl
from jax.experimental.pallas import tpu as pltpu


def _round_up(x, m):
    return ((x + m - 1) // m) * m


def _pose_loss_kernel(sx_ref, sq_ref, packed_ref,
                      loss_ref, lx_ref, lq_ref,
                      acc_x_ref, acc_q_ref, *, n_x, n_q):
    i = pl.program_id(0)

    @pl.when(i == 0)
    def _init():
        acc_x_ref[...] = jnp.zeros_like(acc_x_ref)
        acc_q_ref[...] = jnp.zeros_like(acc_q_ref)

    blk = packed_ref[...]                 # (16, block_b) f32, lane-dense in batch
    px = blk[0:3, :]                      # pred_x^T
    pq = blk[3:7, :]                      # pred_q^T
    tx = blk[8:11, :]                     # target_x^T
    tq = blk[11:15, :]                    # target_q^T

    # --- quaternion L2 normalization along component (sublane) axis ---
    # sum of squares = 3 VPU adds over sublane rows; one rsqrt + one multiply.
    sumsq = (pq[0:1, :] * pq[0:1, :]
             + pq[1:2, :] * pq[1:2, :]
             + pq[2:3, :] * pq[2:3, :]
             + pq[3:4, :] * pq[3:4, :])
    inv = jax.lax.rsqrt(jnp.maximum(sumsq, 1e-24))   # (1e-12)^2 clamp == F.normalize eps
    pq_n = pq * inv                                  # broadcast over 4 sublane rows

    # --- accumulate |diff| sums (padded lanes are all-zero -> contribute 0) ---
    acc_x_ref[...] += jnp.sum(jnp.abs(px - tx), keepdims=True)
    acc_q_ref[...] += jnp.sum(jnp.abs(pq_n - tq), keepdims=True)

    @pl.when(i == pl.num_programs(0) - 1)
    def _finalize():
        loss_x = acc_x_ref[0, 0] * (1.0 / n_x)       # mean over true B*3 elements
        loss_q = acc_q_ref[0, 0] * (1.0 / n_q)       # mean over true B*4 elements
        sx = sx_ref[0]
        sq = sq_ref[0]
        loss_ref[0] = jnp.exp(-sx) * loss_x + sx + jnp.exp(-sq) * loss_q + sq
        lx_ref[0] = loss_x
        lq_ref[0] = loss_q


def pose_loss(pred_x, pred_q, target_x, target_q, sx, sq, *, block_b=512):
    """Pallas wrapper. pred_x/target_x: (B,3); pred_q/target_q: (B,4); sx,sq: (1,) f32."""
    B = pred_x.shape[0]

    # Choose a lane-aligned block size; single block for small batches.
    if B <= block_b:
        block_b = max(128, _round_up(B, 128))
    Bp = _round_up(B, block_b)

    # Host-side lane-dense packing into one slab (zero padding elsewhere).
    packed = jnp.zeros((16, Bp), jnp.float32)
    packed = packed.at[0:3, :B].set(pred_x.astype(jnp.float32).T)
    packed = packed.at[3:7, :B].set(pred_q.astype(jnp.float32).T)
    packed = packed.at[8:11, :B].set(target_x.astype(jnp.float32).T)
    packed = packed.at[11:15, :B].set(target_q.astype(jnp.float32).T)

    kernel = functools.partial(_pose_loss_kernel,
                               n_x=float(B * 3), n_q=float(B * 4))

    out_shape = (
        jax.ShapeDtypeStruct((1,), jnp.float32),  # loss
        jax.ShapeDtypeStruct((1,), jnp.float32),  # loss_x
        jax.ShapeDtypeStruct((1,), jnp.float32),  # loss_q
    )

    return pl.pallas_call(
        kernel,
        out_shape=out_shape,
        grid=(Bp // block_b,),
        in_specs=[
            pl.BlockSpec(memory_space=pltpu.MemorySpace.SMEM),      # sx
            pl.BlockSpec(memory_space=pltpu.MemorySpace.SMEM),      # sq
            pl.BlockSpec((16, block_b), lambda i: (0, i)),          # packed slab (VMEM)
        ],
        out_specs=(
            pl.BlockSpec(memory_space=pltpu.MemorySpace.SMEM),
            pl.BlockSpec(memory_space=pltpu.MemorySpace.SMEM),
            pl.BlockSpec(memory_space=pltpu.MemorySpace.SMEM),
        ),
        scratch_shapes=[
            pltpu.VMEM((1, 1), jnp.float32),   # running sum |pred_x - target_x|
            pltpu.VMEM((1, 1), jnp.float32),   # running sum |pred_q_n - target_q|
        ],
        compiler_params=pltpu.CompilerParams(
            dimension_semantics=("arbitrary",)),
    )(sx, sq, packed)


def pose_loss_ref(pred_x, pred_q, target_x, target_q, sx, sq):
    """Pure-JAX reference for sanity checking."""
    norm = jnp.maximum(jnp.linalg.norm(pred_q, axis=1, keepdims=True), 1e-12)
    pq_n = pred_q / norm
    loss_x = jnp.mean(jnp.abs(pred_x - target_x))
    loss_q = jnp.mean(jnp.abs(pq_n - target_q))
    loss = jnp.exp(-sx[0]) * loss_x + sx[0] + jnp.exp(-sq[0]) * loss_q + sq[0]
    return loss, loss_x, loss_q


def _check(B, key, block_b=512):
    k1, k2, k3, k4 = jax.random.split(key, 4)
    pred_x = jax.random.normal(k1, (B, 3), dtype=jnp.float32)
    pred_q = jax.random.normal(k2, (B, 4), dtype=jnp.float32)
    target_x = jax.random.normal(k3, (B, 3), dtype=jnp.float32)
    target_q = jax.random.normal(k4, (B, 4), dtype=jnp.float32)

    # nn.Parameter(torch.Tensor([0.0])) defaults (sx=0.0, sq=0.0).
    sx = jnp.zeros((1,), dtype=jnp.float32)
    sq = jnp.zeros((1,), dtype=jnp.float32)

    loss, loss_x, loss_q = pose_loss(pred_x, pred_q, target_x, target_q, sx, sq,
                                     block_b=block_b)
    jax.block_until_ready((loss, loss_x, loss_q))

    ref_loss, ref_lx, ref_lq = pose_loss_ref(pred_x, pred_q, target_x, target_q, sx, sq)
    assert jnp.allclose(loss[0], ref_loss, atol=1e-5), (loss, ref_loss)
    assert jnp.allclose(loss_x[0], ref_lx, atol=1e-5), (loss_x, ref_lx)
    assert jnp.allclose(loss_q[0], ref_lq, atol=1e-5), (loss_q, ref_lq)


if __name__ == "__main__":
    key = jax.random.PRNGKey(0)
    k_small, k_big = jax.random.split(key)

    # Small batch (single-block path).
    _check(B=8, key=k_small)

    # Larger (still small) batch exercising the multi-block accumulator path
    # with a ragged tail: B=600, block_b=256 -> grid of 3 blocks, padded lanes masked by zeros.
    _check(B=600, key=k_big, block_b=256)

    print("KERNEL_OK")
</pallas_src>

<mosaic_0001>
module attributes {stable_mosaic.version = 11 : i64} {
  func.func @_pose_loss_kernel(%arg0: i32, %arg1: memref<1xf32, #tpu.memory_space<smem>>, %arg2: memref<1xf32, #tpu.memory_space<smem>>, %arg3: memref<16x128xf32, #tpu.memory_space<vmem>>, %arg4: memref<1xf32, #tpu.memory_space<smem>>, %arg5: memref<1xf32, #tpu.memory_space<smem>>, %arg6: memref<1xf32, #tpu.memory_space<smem>>, %arg7: memref<1x1xf32, #tpu.memory_space<vmem>>, %arg8: memref<1x1xf32, #tpu.memory_space<vmem>>) attributes {dimension_semantics = [#tpu.dimension_semantics<arbitrary>], iteration_bounds = array<i64: 1>, scalar_prefetch = 0 : i64, scratch_operands = 2 : i64, tpu.core_type = #tpu.core_type<tc>, window_params = [{transform_indices = @transform_0, window_bounds = array<i64: 1>}, {transform_indices = @transform_1, window_bounds = array<i64: 1>}, {transform_indices = @transform_2, window_bounds = array<i64: 16, 128>}, {transform_indices = @transform_3, window_bounds = array<i64: 1>}, {transform_indices = @transform_4, window_bounds = array<i64: 1>}, {transform_indices = @transform_5, window_bounds = array<i64: 1>}]} {
    %c0_i32 = arith.constant 0 : i32
    %0 = arith.cmpi eq, %arg0, %c0_i32 : i32
    %1 = arith.extui %0 : i1 to i32
    %c0_i32_0 = arith.constant 0 : i32
    %2 = arith.cmpi ne, %1, %c0_i32_0 : i32
    scf.if %2 {
      %cst_14 = arith.constant 0.000000e+00 : f32
      %51 = vector.broadcast %cst_14 : f32 to vector<1x1xf32>
      %c0_15 = arith.constant 0 : index
      %c0_16 = arith.constant 0 : index
      %52 = vector.load %arg7[%c0_15, %c0_16] : memref<1x1xf32, #tpu.memory_space<vmem>>, vector<1x1xf32>
      tpu.vector_store %arg7[%c0_15, %c0_16], %51 {strides = array<i32>} : memref<1x1xf32, #tpu.memory_space<vmem>>, vector<1x1xf32>,
      %cst_17 = arith.constant 0.000000e+00 : f32
      %53 = vector.broadcast %cst_17 : f32 to vector<1x1xf32>
      %c0_18 = arith.constant 0 : index
      %c0_19 = arith.constant 0 : index
      %54 = vector.load %arg8[%c0_18, %c0_19] : memref<1x1xf32, #tpu.memory_space<vmem>>, vector<1x1xf32>
      tpu.vector_store %arg8[%c0_18, %c0_19], %53 {strides = array<i32>} : memref<1x1xf32, #tpu.memory_space<vmem>>, vector<1x1xf32>,
    } else {
    }
    %c0 = arith.constant 0 : index
    %c0_1 = arith.constant 0 : index
    %3 = vector.load %arg3[%c0, %c0_1] : memref<16x128xf32, #tpu.memory_space<vmem>>, vector<16x128xf32>
    %4 = vector.extract_strided_slice %3 {offsets = [0, 0], sizes = [3, 128], strides = [1, 1]} : vector<16x128xf32> to vector<3x128xf32>
    %5 = vector.extract_strided_slice %3 {offsets = [3, 0], sizes = [4, 128], strides = [1, 1]} : vector<16x128xf32> to vector<4x128xf32>
    %6 = vector.extract_strided_slice %3 {offsets = [8, 0], sizes = [3, 128], strides = [1, 1]} : vector<16x128xf32> to vector<3x128xf32>
    %7 = vector.extract_strided_slice %3 {offsets = [11, 0], sizes = [4, 128], strides = [1, 1]} : vector<16x128xf32> to vector<4x128xf32>
    %8 = vector.extract_strided_slice %5 {offsets = [0, 0], sizes = [1, 128], strides = [1, 1]} : vector<4x128xf32> to vector<1x128xf32>
    %9 = vector.extract_strided_slice %5 {offsets = [0, 0], sizes = [1, 128], strides = [1, 1]} : vector<4x128xf32> to vector<1x128xf32>
    %10 = arith.mulf %8, %9 : vector<1x128xf32>
    %11 = vector.extract_strided_slice %5 {offsets = [1, 0], sizes = [1, 128], strides = [1, 1]} : vector<4x128xf32> to vector<1x128xf32>
    %12 = vector.extract_strided_slice %5 {offsets = [1, 0], sizes = [1, 128], strides = [1, 1]} : vector<4x128xf32> to vector<1x128xf32>
    %13 = arith.mulf %11, %12 : vector<1x128xf32>
    %14 = arith.addf %10, %13 : vector<1x128xf32>
    %15 = vector.extract_strided_slice %5 {offsets = [2, 0], sizes = [1, 128], strides = [1, 1]} : vector<4x128xf32> to vector<1x128xf32>
    %16 = vector.extract_strided_slice %5 {offsets = [2, 0], sizes = [1, 128], strides = [1, 1]} : vector<4x128xf32> to vector<1x128xf32>
    %17 = arith.mulf %15, %16 : vector<1x128xf32>
    %18 = arith.addf %14, %17 : vector<1x128xf32>
    %19 = vector.extract_strided_slice %5 {offsets = [3, 0], sizes = [1, 128], strides = [1, 1]} : vector<4x128xf32> to vector<1x128xf32>
    %20 = vector.extract_strided_slice %5 {offsets = [3, 0], sizes = [1, 128], strides = [1, 1]} : vector<4x128xf32> to vector<1x128xf32>
    %21 = arith.mulf %19, %20 : vector<1x128xf32>
    %22 = arith.addf %18, %21 : vector<1x128xf32>
    %cst = arith.constant 1.000000e-24 : f32
    %23 = vector.broadcast %cst : f32 to vector<1x128xf32>
    %24 = arith.maximumf %22, %23 : vector<1x128xf32>
    %25 = math.rsqrt %24 : vector<1x128xf32>
    %26 = vector.broadcast %25 : vector<1x128xf32> to vector<4x128xf32>
    %27 = arith.mulf %5, %26 : vector<4x128xf32>
    %c0_2 = arith.constant 0 : index
    %c0_3 = arith.constant 0 : index
    %28 = vector.load %arg7[%c0_2, %c0_3] : memref<1x1xf32, #tpu.memory_space<vmem>>, vector<1x1xf32>
    %29 = arith.subf %4, %6 : vector<3x128xf32>
    %30 = math.absf %29 : vector<3x128xf32>
    %31 = vector.shape_cast %30 : vector<3x128xf32> to vector<1x3x128xf32>
    %cst_4 = arith.constant dense<0.000000e+00> : vector<1xf32>
    %32 = vector.multi_reduction <add>, %31, %cst_4 [1, 2] : vector<1x3x128xf32> to vector<1xf32>
    %33 = vector.shape_cast %32 : vector<1xf32> to vector<1x1x1xf32>
    %34 = vector.extract %33[0, 0, 0] : f32 from vector<1x1x1xf32>
    %35 = vector.broadcast %34 : f32 to vector<1x1xf32>
    %36 = arith.addf %28, %35 : vector<1x1xf32>
    %c0_5 = arith.constant 0 : index
    %c0_6 = arith.constant 0 : index
    %37 = vector.load %arg7[%c0_5, %c0_6] : memref<1x1xf32, #tpu.memory_space<vmem>>, vector<1x1xf32>
    tpu.vector_store %arg7[%c0_5, %c0_6], %36 {strides = array<i32>} : memref<1x1xf32, #tpu.memory_space<vmem>>, vector<1x1xf32>,
    %c0_7 = arith.constant 0 : index
    %c0_8 = arith.constant 0 : index
    %38 = vector.load %arg8[%c0_7, %c0_8] : memref<1x1xf32, #tpu.memory_space<vmem>>, vector<1x1xf32>
    %39 = arith.subf %27, %7 : vector<4x128xf32>
    %40 = math.absf %39 : vector<4x128xf32>
    %41 = vector.shape_cast %40 : vector<4x128xf32> to vector<1x4x128xf32>
    %cst_9 = arith.constant dense<0.000000e+00> : vector<1xf32>
    %42 = vector.multi_reduction <add>, %41, %cst_9 [1, 2] : vector<1x4x128xf32> to vector<1xf32>
    %43 = vector.shape_cast %42 : vector<1xf32> to vector<1x1x1xf32>
    %44 = vector.extract %43[0, 0, 0] : f32 from vector<1x1x1xf32>
    %45 = vector.broadcast %44 : f32 to vector<1x1xf32>
    %46 = arith.addf %38, %45 : vector<1x1xf32>
    %c0_10 = arith.constant 0 : index
    %c0_11 = arith.constant 0 : index
    %47 = vector.load %arg8[%c0_10, %c0_11] : memref<1x1xf32, #tpu.memory_space<vmem>>, vector<1x1xf32>
    tpu.vector_store %arg8[%c0_10, %c0_11], %46 {strides = array<i32>} : memref<1x1xf32, #tpu.memory_space<vmem>>, vector<1x1xf32>,
    %c0_i32_12 = arith.constant 0 : i32
    %48 = arith.cmpi eq, %arg0, %c0_i32_12 : i32
    %49 = arith.extui %48 : i1 to i32
    %c0_i32_13 = arith.constant 0 : i32
    %50 = arith.cmpi ne, %49, %c0_i32_13 : i32
    scf.if %50 {
      %c0_14 = arith.constant 0 : index
      %c0_15 = arith.constant 0 : index
      %51 = vector.load %arg7[%c0_14, %c0_15] : memref<1x1xf32, #tpu.memory_space<vmem>>, vector<1x1xf32>
      %52 = vector.extract %51[0, 0] : f32 from vector<1x1xf32>
      %cst_16 = arith.constant 0.0416666679 : f32
      %53 = arith.mulf %52, %cst_16 : f32
      %c0_17 = arith.constant 0 : index
      %c0_18 = arith.constant 0 : index
      %54 = vector.load %arg8[%c0_17, %c0_18] : memref<1x1xf32, #tpu.memory_space<vmem>>, vector<1x1xf32>
      %55 = vector.extract %54[0, 0] : f32 from vector<1x1xf32>
      %cst_19 = arith.constant 3.125000e-02 : f32
      %56 = arith.mulf %55, %cst_19 : f32
      %c0_20 = arith.constant 0 : index
      %57 = memref.load %arg1[%c0_20] : memref<1xf32, #tpu.memory_space<smem>>
      %c0_21 = arith.constant 0 : index
      %58 = memref.load %arg2[%c0_21] : memref<1xf32, #tpu.memory_space<smem>>
      %cst_22 = arith.constant 0.000000e+00 : f32
      %59 = arith.subf %cst_22, %57 : f32
      %60 = math.exp %59 : f32
      %61 = arith.mulf %60, %53 : f32
      %62 = arith.addf %61, %57 : f32
      %cst_23 = arith.constant 0.000000e+00 : f32
      %63 = arith.subf %cst_23, %58 : f32
      %64 = math.exp %63 : f32
      %65 = arith.mulf %64, %56 : f32
      %66 = arith.addf %62, %65 : f32
      %67 = arith.addf %66, %58 : f32
      %c0_24 = arith.constant 0 : index
      %68 = memref.load %arg4[%c0_24] : memref<1xf32, #tpu.memory_space<smem>>
      memref.store %67, %arg4[%c0_24] : memref<1xf32, #tpu.memory_space<smem>>
      %c0_25 = arith.constant 0 : index
      %69 = memref.load %arg5[%c0_25] : memref<1xf32, #tpu.memory_space<smem>>
      memref.store %53, %arg5[%c0_25] : memref<1xf32, #tpu.memory_space<smem>>
      %c0_26 = arith.constant 0 : index
      %70 = memref.load %arg6[%c0_26] : memref<1xf32, #tpu.memory_space<smem>>
      memref.store %56, %arg6[%c0_26] : memref<1xf32, #tpu.memory_space<smem>>
    } else {
    }
    return
  }
  func.func @transform_0(%arg0: i32) -> i32 {
    %c0_i32 = arith.constant 0 : i32
    %c0_i32_0 = arith.constant 0 : i32
    return %c0_i32 : i32
  }
  func.func @transform_1(%arg0: i32) -> i32 {
    %c0_i32 = arith.constant 0 : i32
    %c0_i32_0 = arith.constant 0 : i32
    return %c0_i32 : i32
  }
  func.func @transform_2(%arg0: i32) -> (i32, i32) {
    %c0_i32 = arith.constant 0 : i32
    %c0_i32_0 = arith.constant 0 : i32
    return %c0_i32, %arg0 : i32, i32
  }
  func.func @transform_3(%arg0: i32) -> i32 {
    %c0_i32 = arith.constant 0 : i32
    %c0_i32_0 = arith.constant 0 : i32
    return %c0_i32 : i32
  }
  func.func @transform_4(%arg0: i32) -> i32 {
    %c0_i32 = arith.constant 0 : i32
    %c0_i32_0 = arith.constant 0 : i32
    return %c0_i32 : i32
  }
  func.func @transform_5(%arg0: i32) -> i32 {
    %c0_i32 = arith.constant 0 : i32
    %c0_i32_0 = arith.constant 0 : i32
    return %c0_i32 : i32
  }
}

</mosaic_0001>

<bundles_post_ra>
// kernel: tpu_custom_call.1
= control target key start
LH: loop header
LB: loop body
LE: loop exit
PB: predicated region body
PF: predicated region fallthrough
CT: control target
= control target key end

     0   :  { %13 = vsyncpa [#allocation7], 0  ;;  %s353_s0 = inlined_call_operand.<no memory space> [shape: f32[1], index: 0, kind: input, shape index: {}]   ;;  %s354_s1 = inlined_call_operand.<no memory space> [shape: f32[1], index: 1, kind: input, shape index: {}]   ;;  %s355_s2 = inlined_call_operand.hbm [shape: f32[16,128], index: 2, kind: input, shape index: {}]   ;;  %s356_s3 = inlined_call_operand.hbm [shape: f32[1], index: 3, kind: output, shape index: {0}]   ;;  %s357_s4 = inlined_call_operand.hbm [shape: f32[1], index: 4, kind: output, shape index: {1}]   ;;  %s358_s5 = inlined_call_operand.hbm [shape: f32[1], index: 5, kind: output, shape index: {2}]  }
   0x1   :  { %14 = vsyncpa [#allocation8], 0 }
   0x2   :  { %15 = vsyncpa [#allocation11], 0  ;;  %s252_s18 = smov [#allocation6]   ;;  %s194_s22 = scalar_lea.hbm %s355_s2, 256 }
   0x3   :  { %s25_s19 = sshll.u32 %s252_s18, 4  ;;  %p195_p0 = scmp.ne.s32.totalorder %s355_s2, %s194_s22  ;;  %s26_s19 = int_to_ptr.vmem [resolvable:$true] %s25_s19 }
   0x4   :  { %p198_p1 = scmp.lt.u32.totalorder %s194_s22, %s355_s2 }
   0x6   :  { %p200_p2 = pnand %p198_p1, %p195_p0 }
   0x8   :  { %203 = shalt.err (!%p200_p2)
}
   0x9   :  { %s204_s27 = scalar_lea.vmem %s26_s19, 256  ;;  %p209_p4 = scmp.lt.s32.totalorder %s26_s19, %s26_s19 }
   0xa   :  { %p205_p3 = scmp.ne.s32.totalorder %s26_s19, %s204_s27  ;;  %p210_p5 = scmp.lt.s32.totalorder %s204_s27, %s204_s27 }
   0xc   :  { %p211_p6 = por %p210_p5, %p209_p4 }
   0xe   :  { %p212_p7 = pnand %p211_p6, %p205_p3 }
  0x10   :  { %215 = shalt.err (!%p212_p7)
}
  0x11   :  { %s253_s28 = smov 128   ;;  %s254_s29 = smov 8  }
  0x12   :  { %31 = dma.hbm_to_vmem [thread:$0]  %s355_s2, 256, %s26_s19, [#allocation7], %s253_s28, %s253_s28, %s254_s29  }
  0x13   :  { %246 = dma.done.wait [#allocation7], 256  }
  0x14   :  { %247 = vsyncadd [#allocation7], 4294967040  ;;  %v42_v0 = vld [vmem:[#allocation6] sm:$0xff]  ;;  %v43_v1 = vld [vmem:[#allocation6 + $0x8] sm:$0xff]  ;;  %vm65_vm0 = vcmask 1042432   ;;  %v57_v13 = vlaneseq  ;;  %vm86_vm1 = vcmask 1043456  }
  0x15   :  { %v63_v2 = vsub.f32 %v42_v0, %v43_v1  ;;  %v44_v3 = vmul.f32 %v42_v0, %v42_v0  ;;  %vm39_vm2 = vcmask 0   ;;  %v255_v23 = vmov 0.0   ;;  %s111_s9 = ssub.f32 0.0, %s353_s0  ;;  %s216_s18 = scalar_lea.hbm %s357_s4, 16 }
  0x16   :  { %v58_v14 = vshrl.u32 %v57_v13, 7  ;;  %40 = vst.msk [vmem:[#allocation2] sm:$0x1] %vm39_vm2, %v255_v23  ;;  %41 = vst.msk [vmem:[#allocation3] sm:$0x1] %vm39_vm2, %v255_v23  ;;  %s118_s12 = ssub.f32 0.0, %s354_s1  ;;  %p217_p8 = scmp.ne.s32.totalorder %s357_s4, %s216_s18 }
  0x17   :  { %v64_v4 = vand.u32 2147483647, %v63_v2  ;;  %v46_v5 = vrot.slane %v44_v3, 1  ;;  %v49_v6 = vrot.slane %v44_v3, 2  ;;  %v52_v9 = vrot.slane %v44_v3, 3  ;;  %p220_p9 = scmp.lt.u32.totalorder %s216_s18, %s357_s4 }
  0x18   :  { %v59_v15 = vsub.s32 3, %v58_v14  ;;  %v112_v42 = vstv %s111_s9  ;;  %v119_v43 = vstv %s118_s12 }
  0x19   :  { %v66_v7 = vsel %vm65_vm0, %v64_v4, 0.0  ;;  %v48_v8 = vadd.f32 %v46_v5, %v44_v3  ;;  %v113_v44 = vmul.f32 1.442695, %v112_v42  ;;  %v120_v45 = vmul.f32 1.442695, %v119_v43  ;;  %p222_p10 = pnand %p220_p9, %p217_p8 }
  0x1a   :  { %67 = vadd.xlane.f32.xlu0 %v66_v7 }
  0x1b   :  { %v51_v10 = vadd.f32 %v49_v6, %v48_v8 }
  0x1d   :  { %v54_v11 = vadd.f32 %v52_v9, %v51_v10  ;;  %v62_v38 = vld [vmem:[#allocation2] sm:$0x1]  ;;  %v80_v46 = vld [vmem:[#allocation3] sm:$0x1] }
  0x1f   :  { %v55_v12 = vmax.f32 %v54_v11, 1e-24 }
  0x21   :  { %188 = vrsqrt.f32 %v55_v12 }
  0x22   :  { %190 = vpow2.f32 %v113_v44 }
  0x23   :  { %192 = vpow2.f32 %v120_v45 }
  0x2b   :  { %v189_v16 = vpop.eup %188 }
  0x2c   :  { %v60_v17 = vrot.slane %v189_v16, %v59_v15  ;;  %v191_v49 = vpop.eup %190 }
  0x2d   :  { %v193_v50 = vpop.eup %192 }
  0x2e   :  { %v61_v18 = vmul.f32 %v60_v17, %v42_v0 }
  0x30   :  { %v81_v19 = vsub.f32 %v61_v18, %v43_v1 }
  0x32   :  { %v82_v20 = vand.u32 2147483647, %v81_v19 }
  0x34   :  { %v84_v21 = vrot.slane %v82_v20, 3 }
  0x36   :  { %v87_v22 = vsel %vm86_vm1, %v84_v21, 0.0 }
  0x37   :  { %88 = vadd.xlane.f32.xlu0 %v87_v22 }
  0xa7   :  { %v68_v24 = vpop.xlane.xlu0 %67 }
  0xa8   :  { %v69_v25 = vrot.slane %v68_v24, 4 }
  0xaa   :  { %v70_v26 = vadd.f32 %v69_v25, %v68_v24 }
  0xac   :  { %v71_v27 = vrot.slane %v70_v26, 2 }
  0xae   :  { %v72_v28 = vadd.f32 %v71_v27, %v70_v26 }
  0xb0   :  { %v73_v29 = vrot.slane %v72_v28, 1 }
  0xb2   :  { %v74_v30 = vadd.f32 %v73_v29, %v72_v28 }
  0xb4   :  { %169 = vpush %v74_v30 }
  0xc4   :  { %v89_v31 = vpop.xlane.xlu0 %88 }
  0xc5   :  { %v90_v32 = vrot.slane %v89_v31, 4 }
  0xc7   :  { %v91_v33 = vadd.f32 %v90_v32, %v89_v31 }
  0xc9   :  { %v92_v34 = vrot.slane %v91_v33, 2 }
  0xcb   :  { %v93_v35 = vadd.f32 %v92_v34, %v91_v33 }
  0xcd   :  { %v94_v36 = vrot.slane %v93_v35, 1 }
  0xcf   :  { %v95_v37 = vadd.f32 %v94_v36, %v93_v35 }
  0xd1   :  { %171 = vpush %v95_v37 }
  0xe5   :  { %s170_s2 = spop %169 }
  0xe6   :  { %v76_v39 = vstv %s170_s2 }
  0xe7   :  { %v77_v40 = vadd.f32 %v76_v39, %v62_v38 }
  0xe9   :  { %79 = vst.msk [vmem:[#allocation2] sm:$0x1] %vm39_vm2, %v77_v40 }
  0xf0   :  { %v103_v41 = vld [vmem:[#allocation2] sm:$0x1] }
  0xf1   :  { %173 = vpush %v103_v41 }
 0x102   :  { %s172_s13 = spop %171 }
 0x103   :  { %v97_v47 = vstv %s172_s13 }
 0x104   :  { %v98_v48 = vadd.f32 %v97_v47, %v80_v46 }
 0x106   :  { %99 = vst.msk [vmem:[#allocation3] sm:$0x1] %vm39_vm2, %v98_v48 }
 0x10d   :  { %v106_v51 = vld [vmem:[#allocation3] sm:$0x1] }
 0x10e   :  { %175 = vpush %v106_v51 }
 0x10f   :  { %177 = vpush %v191_v49 }
 0x110   :  { %179 = vpush %v193_v50 }
 0x122   :  { %s174_s14 = spop %173 }
 0x123   :  { %s105_s15 = smul.f32 0.041666668, %s174_s14 }
 0x125   :  { %129 = sst [smem:[#allocation10]] %s105_s15 }
 0x126   :  { %225 = shalt.err (!%p222_p10)
}
 0x127   :  { %s256_s23 = smov [#allocation10]   ;;  %s226_s11 = scalar_lea.hbm %s358_s5, 16 }
 0x128   :  { %147 = dma.smem_to_hbm %s256_s23, 16, %s357_s4, [#allocation11]  }
 0x129   :  { %p227_p11 = scmp.ne.s32.totalorder %s358_s5, %s226_s11  ;;  %p230_p12 = scmp.lt.u32.totalorder %s226_s11, %s358_s5 }
 0x12b   :  { %p232_p13 = pnand %p230_p12, %p227_p11 }
 0x13f   :  { %s176_s26 = spop %175 }
 0x140   :  { %s108_s27 = smul.f32 0.03125, %s176_s26  ;;  %s178_s28 = spop %177 }
 0x141   :  { %s116_s29 = smul.f32 %s178_s28, %s105_s15  ;;  %s180_s30 = spop %179 }
 0x142   :  { %131 = sst [smem:[#allocation12]] %s108_s27  ;;  %s123_s6 = smul.f32 %s180_s30, %s108_s27 }
 0x143   :  { %s117_s8 = sadd.f32 %s116_s29, %s353_s0 }
 0x144   :  { %235 = shalt.err (!%p232_p13)
}
 0x145   :  { %s257_s15 = smov [#allocation12]   ;;  %s124_s0 = sadd.f32 %s123_s6, %s117_s8 }
 0x146   :  { %155 = dma.smem_to_hbm %s257_s15, 16, %s358_s5, [#allocation11]  }
 0x147   :  { %s125_s20 = sadd.f32 %s124_s0, %s354_s1  ;;  %s236_s23 = scalar_lea.hbm %s356_s3, 16 }
 0x148   :  { %p237_p0 = scmp.ne.s32.totalorder %s356_s3, %s236_s23  ;;  %p240_p1 = scmp.lt.u32.totalorder %s236_s23, %s356_s3 }
 0x149   :  { %127 = sst [smem:[#allocation9]] %s125_s20 }
 0x14a   :  { %p242_p2 = pnand %p240_p1, %p237_p0 }
 0x14c   :  { %245 = shalt.err (!%p242_p2)
}
 0x14d   :  { %s258_s5 = smov [#allocation9]  }
 0x14e   :  { %139 = dma.smem_to_hbm %s258_s5, 16, %s356_s3, [#allocation8]  }
 0x14f   :  { %248 = dma.done.wait [#allocation8], 16  }
 0x150   :  { %249 = vsyncadd [#allocation8], 4294967280 }
 0x151   :  { %250 = dma.done.wait [#allocation11], 32  }
 0x152   :  { %251 = vsyncadd [#allocation11], 4294967264 }
 0x153   :  { %165 = sfence }
 0x154   :  { %166 = vsyncpa [#allocation7], 1 }
 0x155   :  { %167 = vsyncpa [#allocation8], 1 }
 0x156   :  { %168 = vsyncpa [#allocation11], 1 }

</bundles_post_ra>
